<compile_context>
chip_gen: v7x
topology: tpu7x:2x2x1
jax: 0.10.0
libtpu: 0.0.40
codegen_flags: <defaults>
</compile_context>

<pallas_src>
import functools

import jax
import jax.numpy as jnp
from jax import lax
from jax.experimental import pallas as pl
from jax.experimental.pallas import tpu as pltpu

# ---- model config (small, consistent with the module defaults) ---------------
B = 2          # batch
T = 8          # seq_length
D = 16         # rnn_input_dims
H = 32         # hidden_size
FC1 = 50       # fc1 output features
# n_layers=1, unidirectional, dropout=0, rnn_cell='lstm'


def lstm_mlp_kernel(xg_ref, whh_ref, w1_ref, b1_ref, w4_ref, b4_ref, out_ref):
    """LSTM recurrence + flatten/ReLU/fc1/ReLU/fc4 in one kernel invocation.

    xg_ref : (T, B, 4H)   precomputed x @ W_ih^T + (b_ih + b_hh), gate order i,f,g,o
    whh_ref: (H, 4H)      hidden->gates (PyTorch weight_hh_l0 transposed)
    w1_ref : (T*H, FC1)   fc1 weight transposed; row index = t*H + h (matches .view)
    b1_ref : (1, FC1)
    w4_ref : (FC1, 1)
    b4_ref : (1, 1)
    out_ref: (B, 1)
    """
    nT, nB, _ = xg_ref.shape
    nH = whh_ref.shape[0]

    whh = whh_ref[...]                                   # load once, reused each step

    def cell(gates, c_prev):
        # Two full-vreg EUP passes instead of four quarter-width ones.
        sig = jax.nn.sigmoid(gates)                      # i, f, o come from here
        tnh = jnp.tanh(gates)                            # g comes from here
        ig = sig[:, 0:nH] * tnh[:, 2 * nH:3 * nH]        # i * g
        c = ig if c_prev is None else sig[:, nH:2 * nH] * c_prev + ig
        h = sig[:, 3 * nH:4 * nH] * jnp.tanh(c)          # o * tanh(c)
        return h, c

    # t = 0: h_{-1} = c_{-1} = 0, so gates are just the precomputed input gates.
    h, c = cell(xg_ref[0], None)
    hs = [jnp.maximum(h, 0.0)]                           # relu(out) per timestep

    # T is static and small -> fully unrolled; h/c/hs live in vregs, not VMEM.
    for t in range(1, nT):
        gates = xg_ref[t] + jnp.dot(h, whh, preferred_element_type=jnp.float32)
        h, c = cell(gates, c)
        hs.append(jnp.maximum(h, 0.0))

    # Deferred fc1: one K = T*H matmul instead of T small ones inside the loop.
    hs_flat = jnp.concatenate(hs, axis=1)                # (B, T*H), flat index t*H + h
    y1 = jnp.maximum(
        jnp.dot(hs_flat, w1_ref[...], preferred_element_type=jnp.float32)
        + b1_ref[...],
        0.0)
    out_ref[...] = (jnp.dot(y1, w4_ref[...], preferred_element_type=jnp.float32)
                    + b4_ref[...])


def init_params(key):
    """Deterministic parameter init (PyTorch-LSTM-style uniform ranges)."""
    ks = jax.random.split(key, 8)
    s = 1.0 / jnp.sqrt(H)
    w_ih = jax.random.uniform(ks[0], (4 * H, D), jnp.float32, -s, s)
    w_hh = jax.random.uniform(ks[1], (4 * H, H), jnp.float32, -s, s)
    b_ih = jax.random.uniform(ks[2], (4 * H,), jnp.float32, -s, s)
    b_hh = jax.random.uniform(ks[3], (4 * H,), jnp.float32, -s, s)
    s1 = 1.0 / jnp.sqrt(T * H)
    w1 = jax.random.uniform(ks[4], (FC1, T * H), jnp.float32, -s1, s1)
    b1 = jax.random.uniform(ks[5], (FC1,), jnp.float32, -s1, s1)
    s4 = 1.0 / jnp.sqrt(FC1)
    w4 = jax.random.uniform(ks[6], (1, FC1), jnp.float32, -s4, s4)
    b4 = jax.random.uniform(ks[7], (1,), jnp.float32, -s4, s4)
    return dict(w_ih=w_ih, w_hh=w_hh, b_ih=b_ih, b_hh=b_hh, w1=w1, b1=b1, w4=w4, b4=b4)


@functools.partial(jax.jit, static_argnames=())
def rnn_model_forward(x, params):
    """x: (B, T, D) batch-first, as in the PyTorch module."""
    x = x.astype(jnp.float32)
    bg = params["b_ih"] + params["b_hh"]                               # (4H,)
    # Input projection hoisted out of the recurrence: one big lane-dense matmul.
    xg = jnp.einsum("btd,gd->tbg", x, params["w_ih"]) + bg             # (T, B, 4H)
    whh_T = params["w_hh"].T                                           # (H, 4H)
    w1_T = params["w1"].T                                              # (T*H, FC1)
    b1 = params["b1"].reshape(1, FC1)                                  # (1, FC1)
    w4_T = params["w4"].T                                              # (FC1, 1)
    b4 = params["b4"].reshape(1, 1)                                    # (1, 1)

    return pl.pallas_call(
        lstm_mlp_kernel,
        out_shape=jax.ShapeDtypeStruct((B, 1), jnp.float32),
        in_specs=[pl.BlockSpec(memory_space=pltpu.MemorySpace.VMEM)] * 6,
        out_specs=pl.BlockSpec(memory_space=pltpu.MemorySpace.VMEM),
    )(xg, whh_T, w1_T, b1, w4_T, b4)


def reference_forward(x, params):
    """Pure-JAX reference of the PyTorch forward for a correctness check."""
    w_ih, w_hh = params["w_ih"], params["w_hh"]
    bg = params["b_ih"] + params["b_hh"]

    def step(carry, xt):
        h, c = carry
        gates = xt @ w_ih.T + h @ w_hh.T + bg
        i = jax.nn.sigmoid(gates[:, 0:H])
        f = jax.nn.sigmoid(gates[:, H:2 * H])
        g = jnp.tanh(gates[:, 2 * H:3 * H])
        o = jax.nn.sigmoid(gates[:, 3 * H:4 * H])
        c = f * c + i * g
        h = o * jnp.tanh(c)
        return (h, c), h

    h0 = jnp.zeros((B, H), jnp.float32)
    c0 = jnp.zeros((B, H), jnp.float32)
    _, hs = lax.scan(step, (h0, c0), jnp.transpose(x, (1, 0, 2)))  # (T, B, H)
    out = jnp.transpose(hs, (1, 0, 2)).reshape(B, T * H)
    y = jnp.maximum(out, 0.0)
    y = y @ params["w1"].T + params["b1"]
    y = jnp.maximum(y, 0.0)
    y = y @ params["w4"].T + params["b4"]
    return y


if __name__ == "__main__":
    key = jax.random.PRNGKey(0)
    kx, kp = jax.random.split(key)
    x = jax.random.normal(kx, (B, T, D), jnp.float32)   # batch-first (B, T, D)
    params = init_params(kp)

    out = rnn_model_forward(x, params)
    out = jax.block_until_ready(out)

    ref = reference_forward(x, params)
    assert out.shape == (B, 1)
    assert jnp.allclose(out, ref, atol=2e-4, rtol=2e-4), (out, ref)

    print("KERNEL_OK")
</pallas_src>

<mosaic_0001>
module attributes {stable_mosaic.version = 11 : i64} {
  func.func @lstm_mlp_kernel(%arg0: memref<8x2x128xf32, #tpu.memory_space<vmem>>, %arg1: memref<32x128xf32, #tpu.memory_space<vmem>>, %arg2: memref<256x50xf32, #tpu.memory_space<vmem>>, %arg3: memref<1x50xf32, #tpu.memory_space<vmem>>, %arg4: memref<50x1xf32, #tpu.memory_space<vmem>>, %arg5: memref<1x1xf32, #tpu.memory_space<vmem>>, %arg6: memref<2x1xf32, #tpu.memory_space<vmem>>) attributes {dimension_semantics = [], scalar_prefetch = 0 : i64, scratch_operands = 0 : i64, tpu.core_type = #tpu.core_type<tc>} {
    %c0 = arith.constant 0 : index
    %c0_0 = arith.constant 0 : index
    %0 = vector.load %arg1[%c0, %c0_0] : memref<32x128xf32, #tpu.memory_space<vmem>>, vector<32x128xf32>
    %c0_1 = arith.constant 0 : index
    %c0_2 = arith.constant 0 : index
    %c0_3 = arith.constant 0 : index
    %1 = vector.load %arg0[%c0_1, %c0_2, %c0_3] : memref<8x2x128xf32, #tpu.memory_space<vmem>>, vector<1x2x128xf32>
    %2 = vector.shape_cast %1 : vector<1x2x128xf32> to vector<2x128xf32>
    %3 = arith.negf %2 : vector<2x128xf32>
    %4 = math.exp %3 : vector<2x128xf32>
    %cst = arith.constant 1.000000e+00 : f32
    %5 = vector.broadcast %cst : f32 to vector<2x128xf32>
    %6 = arith.addf %5, %4 : vector<2x128xf32>
    %7 = arith.divf %5, %6 : vector<2x128xf32>
    %8 = math.tanh %2 : vector<2x128xf32>
    %9 = vector.extract_strided_slice %7 {offsets = [0, 0], sizes = [2, 32], strides = [1, 1]} : vector<2x128xf32> to vector<2x32xf32>
    %10 = vector.extract_strided_slice %8 {offsets = [0, 64], sizes = [2, 32], strides = [1, 1]} : vector<2x128xf32> to vector<2x32xf32>
    %11 = arith.mulf %9, %10 : vector<2x32xf32>
    %12 = vector.extract_strided_slice %7 {offsets = [0, 96], sizes = [2, 32], strides = [1, 1]} : vector<2x128xf32> to vector<2x32xf32>
    %13 = math.tanh %11 : vector<2x32xf32>
    %14 = arith.mulf %12, %13 : vector<2x32xf32>
    %cst_4 = arith.constant 0.000000e+00 : f32
    %15 = vector.broadcast %cst_4 : f32 to vector<2x32xf32>
    %16 = arith.maximumf %14, %15 : vector<2x32xf32>
    %c1 = arith.constant 1 : index
    %c0_5 = arith.constant 0 : index
    %c0_6 = arith.constant 0 : index
    %17 = vector.load %arg0[%c1, %c0_5, %c0_6] : memref<8x2x128xf32, #tpu.memory_space<vmem>>, vector<1x2x128xf32>
    %18 = vector.shape_cast %17 : vector<1x2x128xf32> to vector<2x128xf32>
    %cst_7 = arith.constant dense<0.000000e+00> : vector<2x128xf32>
    %19 = tpu.matmul %14, %0, %cst_7 {dimension_numbers = #tpu.dot_dimension_numbers<[1], [0], [0], [1], [0, 0, 1, 1], [], []>} : vector<2x32xf32>, vector<32x128xf32>, vector<2x128xf32> -> vector<2x128xf32>
    %20 = arith.addf %18, %19 : vector<2x128xf32>
    %21 = arith.negf %20 : vector<2x128xf32>
    %22 = math.exp %21 : vector<2x128xf32>
    %cst_8 = arith.constant 1.000000e+00 : f32
    %23 = vector.broadcast %cst_8 : f32 to vector<2x128xf32>
    %24 = arith.addf %23, %22 : vector<2x128xf32>
    %25 = arith.divf %23, %24 : vector<2x128xf32>
    %26 = math.tanh %20 : vector<2x128xf32>
    %27 = vector.extract_strided_slice %25 {offsets = [0, 0], sizes = [2, 32], strides = [1, 1]} : vector<2x128xf32> to vector<2x32xf32>
    %28 = vector.extract_strided_slice %26 {offsets = [0, 64], sizes = [2, 32], strides = [1, 1]} : vector<2x128xf32> to vector<2x32xf32>
    %29 = arith.mulf %27, %28 : vector<2x32xf32>
    %30 = vector.extract_strided_slice %25 {offsets = [0, 32], sizes = [2, 32], strides = [1, 1]} : vector<2x128xf32> to vector<2x32xf32>
    %31 = arith.mulf %30, %11 : vector<2x32xf32>
    %32 = arith.addf %31, %29 : vector<2x32xf32>
    %33 = vector.extract_strided_slice %25 {offsets = [0, 96], sizes = [2, 32], strides = [1, 1]} : vector<2x128xf32> to vector<2x32xf32>
    %34 = math.tanh %32 : vector<2x32xf32>
    %35 = arith.mulf %33, %34 : vector<2x32xf32>
    %cst_9 = arith.constant 0.000000e+00 : f32
    %36 = vector.broadcast %cst_9 : f32 to vector<2x32xf32>
    %37 = arith.maximumf %35, %36 : vector<2x32xf32>
    %c2 = arith.constant 2 : index
    %c0_10 = arith.constant 0 : index
    %c0_11 = arith.constant 0 : index
    %38 = vector.load %arg0[%c2, %c0_10, %c0_11] : memref<8x2x128xf32, #tpu.memory_space<vmem>>, vector<1x2x128xf32>
    %39 = vector.shape_cast %38 : vector<1x2x128xf32> to vector<2x128xf32>
    %cst_12 = arith.constant dense<0.000000e+00> : vector<2x128xf32>
    %40 = tpu.matmul %35, %0, %cst_12 {dimension_numbers = #tpu.dot_dimension_numbers<[1], [0], [0], [1], [0, 0, 1, 1], [], []>} : vector<2x32xf32>, vector<32x128xf32>, vector<2x128xf32> -> vector<2x128xf32>
    %41 = arith.addf %39, %40 : vector<2x128xf32>
    %42 = arith.negf %41 : vector<2x128xf32>
    %43 = math.exp %42 : vector<2x128xf32>
    %cst_13 = arith.constant 1.000000e+00 : f32
    %44 = vector.broadcast %cst_13 : f32 to vector<2x128xf32>
    %45 = arith.addf %44, %43 : vector<2x128xf32>
    %46 = arith.divf %44, %45 : vector<2x128xf32>
    %47 = math.tanh %41 : vector<2x128xf32>
    %48 = vector.extract_strided_slice %46 {offsets = [0, 0], sizes = [2, 32], strides = [1, 1]} : vector<2x128xf32> to vector<2x32xf32>
    %49 = vector.extract_strided_slice %47 {offsets = [0, 64], sizes = [2, 32], strides = [1, 1]} : vector<2x128xf32> to vector<2x32xf32>
    %50 = arith.mulf %48, %49 : vector<2x32xf32>
    %51 = vector.extract_strided_slice %46 {offsets = [0, 32], sizes = [2, 32], strides = [1, 1]} : vector<2x128xf32> to vector<2x32xf32>
    %52 = arith.mulf %51, %32 : vector<2x32xf32>
    %53 = arith.addf %52, %50 : vector<2x32xf32>
    %54 = vector.extract_strided_slice %46 {offsets = [0, 96], sizes = [2, 32], strides = [1, 1]} : vector<2x128xf32> to vector<2x32xf32>
    %55 = math.tanh %53 : vector<2x32xf32>
    %56 = arith.mulf %54, %55 : vector<2x32xf32>
    %cst_14 = arith.constant 0.000000e+00 : f32
    %57 = vector.broadcast %cst_14 : f32 to vector<2x32xf32>
    %58 = arith.maximumf %56, %57 : vector<2x32xf32>
    %c3 = arith.constant 3 : index
    %c0_15 = arith.constant 0 : index
    %c0_16 = arith.constant 0 : index
    %59 = vector.load %arg0[%c3, %c0_15, %c0_16] : memref<8x2x128xf32, #tpu.memory_space<vmem>>, vector<1x2x128xf32>
    %60 = vector.shape_cast %59 : vector<1x2x128xf32> to vector<2x128xf32>
    %cst_17 = arith.constant dense<0.000000e+00> : vector<2x128xf32>
    %61 = tpu.matmul %56, %0, %cst_17 {dimension_numbers = #tpu.dot_dimension_numbers<[1], [0], [0], [1], [0, 0, 1, 1], [], []>} : vector<2x32xf32>, vector<32x128xf32>, vector<2x128xf32> -> vector<2x128xf32>
    %62 = arith.addf %60, %61 : vector<2x128xf32>
    %63 = arith.negf %62 : vector<2x128xf32>
    %64 = math.exp %63 : vector<2x128xf32>
    %cst_18 = arith.constant 1.000000e+00 : f32
    %65 = vector.broadcast %cst_18 : f32 to vector<2x128xf32>
    %66 = arith.addf %65, %64 : vector<2x128xf32>
    %67 = arith.divf %65, %66 : vector<2x128xf32>
    %68 = math.tanh %62 : vector<2x128xf32>
    %69 = vector.extract_strided_slice %67 {offsets = [0, 0], sizes = [2, 32], strides = [1, 1]} : vector<2x128xf32> to vector<2x32xf32>
    %70 = vector.extract_strided_slice %68 {offsets = [0, 64], sizes = [2, 32], strides = [1, 1]} : vector<2x128xf32> to vector<2x32xf32>
    %71 = arith.mulf %69, %70 : vector<2x32xf32>
    %72 = vector.extract_strided_slice %67 {offsets = [0, 32], sizes = [2, 32], strides = [1, 1]} : vector<2x128xf32> to vector<2x32xf32>
    %73 = arith.mulf %72, %53 : vector<2x32xf32>
    %74 = arith.addf %73, %71 : vector<2x32xf32>
    %75 = vector.extract_strided_slice %67 {offsets = [0, 96], sizes = [2, 32], strides = [1, 1]} : vector<2x128xf32> to vector<2x32xf32>
    %76 = math.tanh %74 : vector<2x32xf32>
    %77 = arith.mulf %75, %76 : vector<2x32xf32>
    %cst_19 = arith.constant 0.000000e+00 : f32
    %78 = vector.broadcast %cst_19 : f32 to vector<2x32xf32>
    %79 = arith.maximumf %77, %78 : vector<2x32xf32>
    %c4 = arith.constant 4 : index
    %c0_20 = arith.constant 0 : index
    %c0_21 = arith.constant 0 : index
    %80 = vector.load %arg0[%c4, %c0_20, %c0_21] : memref<8x2x128xf32, #tpu.memory_space<vmem>>, vector<1x2x128xf32>
    %81 = vector.shape_cast %80 : vector<1x2x128xf32> to vector<2x128xf32>
    %cst_22 = arith.constant dense<0.000000e+00> : vector<2x128xf32>
    %82 = tpu.matmul %77, %0, %cst_22 {dimension_numbers = #tpu.dot_dimension_numbers<[1], [0], [0], [1], [0, 0, 1, 1], [], []>} : vector<2x32xf32>, vector<32x128xf32>, vector<2x128xf32> -> vector<2x128xf32>
    %83 = arith.addf %81, %82 : vector<2x128xf32>
    %84 = arith.negf %83 : vector<2x128xf32>
    %85 = math.exp %84 : vector<2x128xf32>
    %cst_23 = arith.constant 1.000000e+00 : f32
    %86 = vector.broadcast %cst_23 : f32 to vector<2x128xf32>
    %87 = arith.addf %86, %85 : vector<2x128xf32>
    %88 = arith.divf %86, %87 : vector<2x128xf32>
    %89 = math.tanh %83 : vector<2x128xf32>
    %90 = vector.extract_strided_slice %88 {offsets = [0, 0], sizes = [2, 32], strides = [1, 1]} : vector<2x128xf32> to vector<2x32xf32>
    %91 = vector.extract_strided_slice %89 {offsets = [0, 64], sizes = [2, 32], strides = [1, 1]} : vector<2x128xf32> to vector<2x32xf32>
    %92 = arith.mulf %90, %91 : vector<2x32xf32>
    %93 = vector.extract_strided_slice %88 {offsets = [0, 32], sizes = [2, 32], strides = [1, 1]} : vector<2x128xf32> to vector<2x32xf32>
    %94 = arith.mulf %93, %74 : vector<2x32xf32>
    %95 = arith.addf %94, %92 : vector<2x32xf32>
    %96 = vector.extract_strided_slice %88 {offsets = [0, 96], sizes = [2, 32], strides = [1, 1]} : vector<2x128xf32> to vector<2x32xf32>
    %97 = math.tanh %95 : vector<2x32xf32>
    %98 = arith.mulf %96, %97 : vector<2x32xf32>
    %cst_24 = arith.constant 0.000000e+00 : f32
    %99 = vector.broadcast %cst_24 : f32 to vector<2x32xf32>
    %100 = arith.maximumf %98, %99 : vector<2x32xf32>
    %c5 = arith.constant 5 : index
    %c0_25 = arith.constant 0 : index
    %c0_26 = arith.constant 0 : index
    %101 = vector.load %arg0[%c5, %c0_25, %c0_26] : memref<8x2x128xf32, #tpu.memory_space<vmem>>, vector<1x2x128xf32>
    %102 = vector.shape_cast %101 : vector<1x2x128xf32> to vector<2x128xf32>
    %cst_27 = arith.constant dense<0.000000e+00> : vector<2x128xf32>
    %103 = tpu.matmul %98, %0, %cst_27 {dimension_numbers = #tpu.dot_dimension_numbers<[1], [0], [0], [1], [0, 0, 1, 1], [], []>} : vector<2x32xf32>, vector<32x128xf32>, vector<2x128xf32> -> vector<2x128xf32>
    %104 = arith.addf %102, %103 : vector<2x128xf32>
    %105 = arith.negf %104 : vector<2x128xf32>
    %106 = math.exp %105 : vector<2x128xf32>
    %cst_28 = arith.constant 1.000000e+00 : f32
    %107 = vector.broadcast %cst_28 : f32 to vector<2x128xf32>
    %108 = arith.addf %107, %106 : vector<2x128xf32>
    %109 = arith.divf %107, %108 : vector<2x128xf32>
    %110 = math.tanh %104 : vector<2x128xf32>
    %111 = vector.extract_strided_slice %109 {offsets = [0, 0], sizes = [2, 32], strides = [1, 1]} : vector<2x128xf32> to vector<2x32xf32>
    %112 = vector.extract_strided_slice %110 {offsets = [0, 64], sizes = [2, 32], strides = [1, 1]} : vector<2x128xf32> to vector<2x32xf32>
    %113 = arith.mulf %111, %112 : vector<2x32xf32>
    %114 = vector.extract_strided_slice %109 {offsets = [0, 32], sizes = [2, 32], strides = [1, 1]} : vector<2x128xf32> to vector<2x32xf32>
    %115 = arith.mulf %114, %95 : vector<2x32xf32>
    %116 = arith.addf %115, %113 : vector<2x32xf32>
    %117 = vector.extract_strided_slice %109 {offsets = [0, 96], sizes = [2, 32], strides = [1, 1]} : vector<2x128xf32> to vector<2x32xf32>
    %118 = math.tanh %116 : vector<2x32xf32>
    %119 = arith.mulf %117, %118 : vector<2x32xf32>
    %cst_29 = arith.constant 0.000000e+00 : f32
    %120 = vector.broadcast %cst_29 : f32 to vector<2x32xf32>
    %121 = arith.maximumf %119, %120 : vector<2x32xf32>
    %c6 = arith.constant 6 : index
    %c0_30 = arith.constant 0 : index
    %c0_31 = arith.constant 0 : index
    %122 = vector.load %arg0[%c6, %c0_30, %c0_31] : memref<8x2x128xf32, #tpu.memory_space<vmem>>, vector<1x2x128xf32>
    %123 = vector.shape_cast %122 : vector<1x2x128xf32> to vector<2x128xf32>
    %cst_32 = arith.constant dense<0.000000e+00> : vector<2x128xf32>
    %124 = tpu.matmul %119, %0, %cst_32 {dimension_numbers = #tpu.dot_dimension_numbers<[1], [0], [0], [1], [0, 0, 1, 1], [], []>} : vector<2x32xf32>, vector<32x128xf32>, vector<2x128xf32> -> vector<2x128xf32>
    %125 = arith.addf %123, %124 : vector<2x128xf32>
    %126 = arith.negf %125 : vector<2x128xf32>
    %127 = math.exp %126 : vector<2x128xf32>
    %cst_33 = arith.constant 1.000000e+00 : f32
    %128 = vector.broadcast %cst_33 : f32 to vector<2x128xf32>
    %129 = arith.addf %128, %127 : vector<2x128xf32>
    %130 = arith.divf %128, %129 : vector<2x128xf32>
    %131 = math.tanh %125 : vector<2x128xf32>
    %132 = vector.extract_strided_slice %130 {offsets = [0, 0], sizes = [2, 32], strides = [1, 1]} : vector<2x128xf32> to vector<2x32xf32>
    %133 = vector.extract_strided_slice %131 {offsets = [0, 64], sizes = [2, 32], strides = [1, 1]} : vector<2x128xf32> to vector<2x32xf32>
    %134 = arith.mulf %132, %133 : vector<2x32xf32>
    %135 = vector.extract_strided_slice %130 {offsets = [0, 32], sizes = [2, 32], strides = [1, 1]} : vector<2x128xf32> to vector<2x32xf32>
    %136 = arith.mulf %135, %116 : vector<2x32xf32>
    %137 = arith.addf %136, %134 : vector<2x32xf32>
    %138 = vector.extract_strided_slice %130 {offsets = [0, 96], sizes = [2, 32], strides = [1, 1]} : vector<2x128xf32> to vector<2x32xf32>
    %139 = math.tanh %137 : vector<2x32xf32>
    %140 = arith.mulf %138, %139 : vector<2x32xf32>
    %cst_34 = arith.constant 0.000000e+00 : f32
    %141 = vector.broadcast %cst_34 : f32 to vector<2x32xf32>
    %142 = arith.maximumf %140, %141 : vector<2x32xf32>
    %c7 = arith.constant 7 : index
    %c0_35 = arith.constant 0 : index
    %c0_36 = arith.constant 0 : index
    %143 = vector.load %arg0[%c7, %c0_35, %c0_36] : memref<8x2x128xf32, #tpu.memory_space<vmem>>, vector<1x2x128xf32>
    %144 = vector.shape_cast %143 : vector<1x2x128xf32> to vector<2x128xf32>
    %cst_37 = arith.constant dense<0.000000e+00> : vector<2x128xf32>
    %145 = tpu.matmul %140, %0, %cst_37 {dimension_numbers = #tpu.dot_dimension_numbers<[1], [0], [0], [1], [0, 0, 1, 1], [], []>} : vector<2x32xf32>, vector<32x128xf32>, vector<2x128xf32> -> vector<2x128xf32>
    %146 = arith.addf %144, %145 : vector<2x128xf32>
    %147 = arith.negf %146 : vector<2x128xf32>
    %148 = math.exp %147 : vector<2x128xf32>
    %cst_38 = arith.constant 1.000000e+00 : f32
    %149 = vector.broadcast %cst_38 : f32 to vector<2x128xf32>
    %150 = arith.addf %149, %148 : vector<2x128xf32>
    %151 = arith.divf %149, %150 : vector<2x128xf32>
    %152 = math.tanh %146 : vector<2x128xf32>
    %153 = vector.extract_strided_slice %151 {offsets = [0, 0], sizes = [2, 32], strides = [1, 1]} : vector<2x128xf32> to vector<2x32xf32>
    %154 = vector.extract_strided_slice %152 {offsets = [0, 64], sizes = [2, 32], strides = [1, 1]} : vector<2x128xf32> to vector<2x32xf32>
    %155 = arith.mulf %153, %154 : vector<2x32xf32>
    %156 = vector.extract_strided_slice %151 {offsets = [0, 32], sizes = [2, 32], strides = [1, 1]} : vector<2x128xf32> to vector<2x32xf32>
    %157 = arith.mulf %156, %137 : vector<2x32xf32>
    %158 = arith.addf %157, %155 : vector<2x32xf32>
    %159 = vector.extract_strided_slice %151 {offsets = [0, 96], sizes = [2, 32], strides = [1, 1]} : vector<2x128xf32> to vector<2x32xf32>
    %160 = math.tanh %158 : vector<2x32xf32>
    %161 = arith.mulf %159, %160 : vector<2x32xf32>
    %cst_39 = arith.constant 0.000000e+00 : f32
    %162 = vector.broadcast %cst_39 : f32 to vector<2x32xf32>
    %163 = arith.maximumf %161, %162 : vector<2x32xf32>
    %164 = tpu.concatenate %16, %37, %58, %79, %100, %121, %142, %163 in 1 : vector<2x32xf32>, vector<2x32xf32>, vector<2x32xf32>, vector<2x32xf32>, vector<2x32xf32>, vector<2x32xf32>, vector<2x32xf32>, vector<2x32xf32> -> vector<2x256xf32>
    %c0_40 = arith.constant 0 : index
    %c0_41 = arith.constant 0 : index
    %165 = vector.load %arg2[%c0_40, %c0_41] : memref<256x50xf32, #tpu.memory_space<vmem>>, vector<256x50xf32>
    %cst_42 = arith.constant dense<0.000000e+00> : vector<2x50xf32>
    %166 = tpu.matmul %164, %165, %cst_42 {dimension_numbers = #tpu.dot_dimension_numbers<[1], [0], [0], [1], [0, 0, 1, 1], [], []>} : vector<2x256xf32>, vector<256x50xf32>, vector<2x50xf32> -> vector<2x50xf32>
    %c0_43 = arith.constant 0 : index
    %c0_44 = arith.constant 0 : index
    %167 = vector.load %arg3[%c0_43, %c0_44] : memref<1x50xf32, #tpu.memory_space<vmem>>, vector<1x50xf32>
    %168 = vector.broadcast %167 : vector<1x50xf32> to vector<2x50xf32>
    %169 = arith.addf %166, %168 : vector<2x50xf32>
    %cst_45 = arith.constant 0.000000e+00 : f32
    %170 = vector.broadcast %cst_45 : f32 to vector<2x50xf32>
    %171 = arith.maximumf %169, %170 : vector<2x50xf32>
    %c0_46 = arith.constant 0 : index
    %c0_47 = arith.constant 0 : index
    %172 = vector.load %arg4[%c0_46, %c0_47] : memref<50x1xf32, #tpu.memory_space<vmem>>, vector<50x1xf32>
    %cst_48 = arith.constant dense<0.000000e+00> : vector<2x1xf32>
    %173 = tpu.matmul %171, %172, %cst_48 {dimension_numbers = #tpu.dot_dimension_numbers<[1], [0], [0], [1], [0, 0, 1, 1], [], []>} : vector<2x50xf32>, vector<50x1xf32>, vector<2x1xf32> -> vector<2x1xf32>
    %c0_49 = arith.constant 0 : index
    %c0_50 = arith.constant 0 : index
    %174 = vector.load %arg5[%c0_49, %c0_50] : memref<1x1xf32, #tpu.memory_space<vmem>>, vector<1x1xf32>
    %175 = vector.broadcast %174 : vector<1x1xf32> to vector<2x1xf32>
    %176 = arith.addf %173, %175 : vector<2x1xf32>
    %c0_51 = arith.constant 0 : index
    %c0_52 = arith.constant 0 : index
    %177 = vector.load %arg6[%c0_51, %c0_52] : memref<2x1xf32, #tpu.memory_space<vmem>>, vector<2x1xf32>
    tpu.vector_store %arg6[%c0_51, %c0_52], %176 {strides = array<i32>} : memref<2x1xf32, #tpu.memory_space<vmem>>, vector<2x1xf32>,
    return
  }
}

</mosaic_0001>

<bundles_post_ra>
// kernel: rnn_model_forward.1
= control target key start
LH: loop header
LB: loop body
LE: loop exit
PB: predicated region body
PF: predicated region fallthrough
CT: control target
= control target key end

     0   :  { %s1381_s23 = smov 64   ;;  %v1382_v8 = vmov 0.0|0.0   ;;  %vm1383_vm0 = vmmov 0   ;;  %v1384_v12 = vmov 0.0   ;;  %s1386_s8 = smov 32   ;;  %vm54_vm1 = vcmask 261120   ;;  %s1710_s0 = inlined_call_operand.vmem [shape: f32[8,2,128], index: 0, kind: input, shape index: {}]   ;;  %s1711_s1 = inlined_call_operand.vmem [shape: f32[32,128], index: 1, kind: input, shape index: {}]   ;;  %s1712_s2 = inlined_call_operand.vmem [shape: f32[256,50], index: 2, kind: input, shape index: {}]   ;;  %s1713_s4 = inlined_call_operand.vmem [shape: f32[50,1], index: 4, kind: input, shape index: {}]   ;;  %s1714_s5 = inlined_call_operand.<no memory space> [shape: f32[1,1], index: 5, kind: input, shape index: {}]   ;;  %s1715_s3 = inlined_call_operand.vmem [shape: f32[1,50], index: 3, kind: input, shape index: {}]   ;;  %s1716_s6 = inlined_call_operand.vmem [shape: f32[2,1], index: 6, kind: output, shape index: {}]  }
   0x1   :  { %v29_v0 = vld [vmem:[%s1710_s0] sm:$0x3]  ;;  %1213 = vmatprep.subr.bf16.mxu0 %v1382_v8  ;;  %v26_v10 = vld [vmem:[%s1711_s1 + $0x8] sm:$0xff]  ;;  %v27_v11 = vld [vmem:[%s1711_s1 + $0x10] sm:$0xff]  ;;  %1127 = vmatprep.mubr.msk.f32.mxu0 %vm1383_vm0, %v1384_v12  ;;  %vm800_vm2 = vcmask 523264   ;;  %vm802_vm3 = vcmask 785408  }
   0x2   :  { %1317 = vtanh.f32 %v29_v0  ;;  %v1015_v2 = vmul.f32 -1.442695, %v29_v0  ;;  %v25_v9 = vld [vmem:[%s1711_s1] sm:$0xff]  ;;  %v28_v14 = vld [vmem:[%s1711_s1 + $0x18] sm:$0xff]  ;;  %1231 = vmatprep.subr.bf16.mxu1 %v1382_v8  ;;  %1160 = vmatprep.mubr.msk.f32.mxu1 %vm1383_vm0, %v1384_v12  ;;  %s1385_s1 = smov 96   ;;  %vm935_vm4 = vcmask 1041408  }
   0x3   :  { %v1438_v13 = vpack.c.bf16 %v26_v10, %v25_v9  ;;  %v1447_v15 = vpack.c.bf16 %v28_v14, %v27_v11  ;;  %v1016_v20 = vld [vmem:[%s1710_s0 + $0x2] sm:$0x3]  ;;  %v1019_v39 = vld [vmem:[%s1710_s0 + $0x4] sm:$0x3]  ;;  %v1022_v57 = vld [vmem:[%s1710_s0 + $0x6] sm:$0x3] }
   0x4   :  { %1319 = vpow2.f32 %v1015_v2  ;;  %v1025_v14 = vld [vmem:[%s1710_s0 + $0x8] sm:$0x3]  ;;  %vm931_vm5 = vcmask 408576   ;;  %vm1009_vm6 = vcmask 1024  }
   0x5   :  { %1215 = vmatpush3.bf16.msra.mxu0 %v1438_v13  ;;  %1233 = vmatpush3.bf16.msra.mxu1 %v1438_v13 }
   0x6   :  { %1216 = vmatprep.subr.bf16.mxu0 %v1382_v8  ;;  %1234 = vmatprep.subr.bf16.mxu1 %v1382_v8 }
   0x9   :  { %1218 = vmatpush3.bf16.msra.mxu0 %v1447_v15  ;;  %1236 = vmatpush3.bf16.msra.mxu1 %v1447_v15 }
   0xa   :  { %1219 = vmatprep.subr.bf16.mxu0 %v1382_v8  ;;  %1243 = vmatprep.subr.bf16.mxu1 %v1382_v8 }
   0xc   :  { %v1318_v1 = vpop.eup %1317 }
   0xd   :  { %38 = vrot.lane.b32.xlu0 %v1318_v1, %s1381_s23 }
   0xe   :  { %v1320_v3 = vpop.eup %1319 }
   0xf   :  { %v33_v4 = vadd.f32 1.0, %v1320_v3 }
  0x11   :  { %1321 = vrcp.f32 %v33_v4 }
  0x1b   :  { %v1322_v5 = vpop.eup %1321 }
  0x7f   :  { %v39_v6 = vpop.permute.xlu0 %38 }
  0x80   :  { %v41_v7 = vmul.f32 %v1322_v5, %v39_v6 }
  0x82   :  { %1323 = vtanh.f32 %v41_v7 }
  0x8c   :  { %v1324_v16 = vpop.eup %1323 }
  0x8d   :  { %44 = vrot.lane.b32.xlu0 %v1324_v16, %s1385_s1 }
  0x91   :  { %141 = vrot.lane.b32.xlu0 %v41_v7, %s1386_s8 }
  0xff   :  { %v45_v17 = vpop.permute.xlu0 %44 }
 0x100   :  { %v1458_v18 = vmul.f32 %v1322_v5, %v45_v17 }
 0x102   :  { %52 = vrot.lane.b32.xlu1 %v1458_v18, %s1386_s8 }
 0x103   :  { %v142_v31 = vpop.permute.xlu0 %141 }
 0x174   :  { %v53_v19 = vpop.permute.xlu1 %52 }
 0x175   :  { %1128 = vmatmul.mubr.msk.f32.vlgmr.msra.gmra.mrb[0].mxu0 %vm54_vm1, %v53_v19 }
 0x176   :  { %1221 = vmatpush3.bf16.msra.mxu0 %v1438_v13  ;;  %1138 = vmatprep.mubr.msk.f32.mxu0 %vm1383_vm0, %v1384_v12 }
 0x177   :  { %1222 = vmatprep.subr.bf16.mxu0 %v1382_v8 }
 0x17a   :  { %1224 = vmatpush3.bf16.msra.mxu0 %v1447_v15 }
 0x17b   :  { %1225 = vmatprep.subr.bf16.mxu0 %v1382_v8 }
 0x248   :  { %v123_v21 = vpop.f32.mrb[0].mxu0 }
 0x249   :  { %v127_v22 = vadd.f32 %v1016_v20, %v123_v21  ;;  %v1129_v23 = vpop.f32.mrb[1].mxu0 }
 0x24b   :  { %1325 = vtanh.f32 %v127_v22  ;;  %v1018_v25 = vmul.f32 -1.442695, %v127_v22 }
 0x24d   :  { %1327 = vpow2.f32 %v1018_v25 }
 0x255   :  { %v1326_v24 = vpop.eup %1325 }
 0x256   :  { %136 = vrot.lane.b32.xlu1 %v1326_v24, %s1381_s23 }
 0x257   :  { %v1328_v26 = vpop.eup %1327 }
 0x258   :  { %v131_v27 = vadd.f32 1.0, %v1328_v26 }
 0x25a   :  { %1329 = vrcp.f32 %v131_v27 }
 0x264   :  { %v1330_v28 = vpop.eup %1329 }
 0x265   :  { %v144_v32 = vmul.f32 %v1330_v28, %v142_v31 }
 0x2c8   :  { %v137_v29 = vpop.permute.xlu1 %136 }
 0x2c9   :  { %v139_v30 = vmul.f32 %v1330_v28, %v137_v29 }
 0x2cb   :  { %146 = vrot.lane.b32.xlu1 %v139_v30, %s1386_s8 }
 0x33d   :  { %v147_v33 = vpop.permute.xlu1 %146 }
 0x33e   :  { %v149_v34 = vadd.f32 %v147_v33, %v144_v32  ;;  %v48_v33 = vmax.f32 %v1458_v18, 0.0  ;;  %v1028_v18 = vld [vmem:[%s1710_s0 + $0xa] sm:$0x3] }
 0x340   :  { %1331 = vtanh.f32 %v149_v34 }
 0x34a   :  { %v1332_v35 = vpop.eup %1331 }
 0x34b   :  { %152 = vrot.lane.b32.xlu0 %v1332_v35, %s1381_s23 }
 0x3bd   :  { %v153_v36 = vpop.permute.xlu0 %152 }
 0x3be   :  { %v1475_v37 = vmul.f32 %v1330_v28, %v153_v36 }
 0x3c0   :  { %160 = vrot.lane.b32.xlu1 %v1475_v37, %s1386_s8 }
 0x432   :  { %v161_v38 = vpop.permute.xlu1 %160 }
 0x433   :  { %1139 = vmatmul.mubr.msk.f32.vlgmr.msra.gmra.mrb[2].mxu0 %vm54_vm1, %v161_v38 }
 0x434   :  { %1227 = vmatpush3.bf16.msra.mxu0 %v1438_v13  ;;  %1149 = vmatprep.mubr.msk.f32.mxu0 %vm1383_vm0, %v1384_v12 }
 0x435   :  { %1228 = vmatprep.subr.bf16.mxu0 %v1382_v8 }
 0x438   :  { %1230 = vmatpush3.bf16.msra.mxu0 %v1447_v15 }
 0x439   :  { %1237 = vmatprep.subr.bf16.mxu0 %v1382_v8 }
 0x506   :  { %v230_v40 = vpop.f32.mrb[2].mxu0 }
 0x507   :  { %v234_v41 = vadd.f32 %v1019_v39, %v230_v40  ;;  %v1140_v42 = vpop.f32.mrb[3].mxu0 }
 0x509   :  { %1333 = vtanh.f32 %v234_v41  ;;  %v1021_v44 = vmul.f32 -1.442695, %v234_v41 }
 0x50b   :  { %1335 = vpow2.f32 %v1021_v44 }
 0x513   :  { %v1334_v43 = vpop.eup %1333 }
 0x514   :  { %243 = vrot.lane.b32.xlu0 %v1334_v43, %s1381_s23 }
 0x515   :  { %v1336_v45 = vpop.eup %1335 }
 0x516   :  { %v238_v46 = vadd.f32 1.0, %v1336_v45 }
 0x518   :  { %1337 = vrcp.f32 %v238_v46 }
 0x522   :  { %v1338_v47 = vpop.eup %1337 }
 0x523   :  { %v247_v50 = vmul.f32 %v1338_v47, %v149_v34 }
 0x586   :  { %v244_v48 = vpop.permute.xlu0 %243 }
 0x587   :  { %v246_v49 = vmul.f32 %v1338_v47, %v244_v48 }
 0x589   :  { %249 = vrot.lane.b32.xlu1 %v246_v49, %s1386_s8 }
 0x5fb   :  { %v250_v51 = vpop.permute.xlu1 %249 }
 0x5fc   :  { %v252_v52 = vadd.f32 %v250_v51, %v247_v50 }
 0x5fe   :  { %1339 = vtanh.f32 %v252_v52 }
 0x608   :  { %v1340_v53 = vpop.eup %1339 }
 0x609   :  { %255 = vrot.lane.b32.xlu0 %v1340_v53, %s1381_s23 }
 0x67b   :  { %v256_v54 = vpop.permute.xlu0 %255 }
 0x67c   :  { %v1492_v55 = vmul.f32 %v1338_v47, %v256_v54 }
 0x67e   :  { %263 = vrot.lane.b32.xlu1 %v1492_v55, %s1386_s8 }
 0x6f0   :  { %v264_v56 = vpop.permute.xlu1 %263 }
 0x6f1   :  { %1150 = vmatmul.mubr.msk.f32.vlgmr.msra.gmra.mrb[4].mxu0 %vm54_vm1, %v264_v56 }
 0x6f2   :  { %1239 = vmatpush3.bf16.msra.mxu0 %v1438_v13  ;;  %1171 = vmatprep.mubr.msk.f32.mxu0 %vm1383_vm0, %v1384_v12 }
 0x6f3   :  { %1240 = vmatprep.subr.bf16.mxu0 %v1382_v8 }
 0x6f6   :  { %1242 = vmatpush3.bf16.msra.mxu0 %v1447_v15 }
 0x6f7   :  { %1249 = vmatprep.subr.bf16.mxu0 %v1382_v8 }
 0x7c4   :  { %v333_v58 = vpop.f32.mrb[4].mxu0 }
 0x7c5   :  { %v337_v59 = vadd.f32 %v1022_v57, %v333_v58  ;;  %v1151_v60 = vpop.f32.mrb[5].mxu0  ;;  %v1031_v57 = vld [vmem:[%s1710_s0 + $0xc] sm:$0x3] }
 0x7c7   :  { %1341 = vtanh.f32 %v337_v59  ;;  %v1024_v62 = vmul.f32 -1.442695, %v337_v59 }
 0x7c9   :  { %1343 = vpow2.f32 %v1024_v62 }
 0x7d1   :  { %v1342_v61 = vpop.eup %1341 }
 0x7d2   :  { %346 = vrot.lane.b32.xlu0 %v1342_v61, %s1381_s23 }
 0x7d3   :  { %v1344_v63 = vpop.eup %1343 }
 0x7d4   :  { %v341_v0 = vadd.f32 1.0, %v1344_v63 }
 0x7d6   :  { %1345 = vrcp.f32 %v341_v0 }
 0x7e0   :  { %v1346_v1 = vpop.eup %1345 }
 0x7e1   :  { %v350_v4 = vmul.f32 %v1346_v1, %v252_v52  ;;  %v156_v52 = vmax.f32 %v1475_v37, 0.0 }
 0x844   :  { %v347_v2 = vpop.permute.xlu0 %346 }
 0x845   :  { %v349_v3 = vmul.f32 %v1346_v1, %v347_v2 }
 0x847   :  { %352 = vrot.lane.b32.xlu1 %v349_v3, %s1386_s8 }
 0x8b9   :  { %v353_v5 = vpop.permute.xlu1 %352 }
 0x8ba   :  { %v355_v6 = vadd.f32 %v353_v5, %v350_v4 }
 0x8bc   :  { %1347 = vtanh.f32 %v355_v6 }
 0x8c6   :  { %v1348_v7 = vpop.eup %1347 }
 0x8c7   :  { %358 = vrot.lane.b32.xlu0 %v1348_v7, %s1381_s23 }
 0x939   :  { %v359_v9 = vpop.permute.xlu0 %358 }
 0x93a   :  { %v1509_v10 = vmul.f32 %v1346_v1, %v359_v9 }
 0x93c   :  { %366 = vrot.lane.b32.xlu1 %v1509_v10, %s1386_s8 }
 0x9ae   :  { %v367_v11 = vpop.permute.xlu1 %366 }
 0x9af   :  { %1161 = vmatmul.mubr.msk.f32.vlgmr.msra.gmra.mrb[0].mxu1 %vm54_vm1, %v367_v11  ;;  %v259_v11 = vmax.f32 %v1492_v55, 0.0 }
 0x9b0   :  { %1245 = vmatpush3.bf16.msra.mxu1 %v1438_v13  ;;  %1182 = vmatprep.mubr.msk.f32.mxu1 %vm1383_vm0, %v1384_v12 }
 0x9b1   :  { %1246 = vmatprep.subr.bf16.mxu1 %v1382_v8 }
 0x9b4   :  { %1248 = vmatpush3.bf16.msra.mxu1 %v1447_v15 }
 0xa82   :  { %v436_v16 = vpop.f32.mrb[0].mxu1 }
 0xa83   :  { %v440_v17 = vadd.f32 %v1025_v14, %v436_v16  ;;  %v1162_v19 = vpop.f32.mrb[1].mxu1 }
 0xa84   :  { %v1034_v19 = vld [vmem:[%s1710_s0 + $0xe] sm:$0x3] }
 0xa85   :  { %1349 = vtanh.f32 %v440_v17  ;;  %v1027_v21 = vmul.f32 -1.442695, %v440_v17 }
 0xa87   :  { %1351 = vpow2.f32 %v1027_v21 }
 0xa8f   :  { %v1350_v20 = vpop.eup %1349 }
 0xa90   :  { %449 = vrot.lane.b32.xlu0 %v1350_v20, %s1381_s23 }
 0xa91   :  { %v1352_v22 = vpop.eup %1351 }
 0xa92   :  { %v444_v23 = vadd.f32 1.0, %v1352_v22 }
 0xa94   :  { %1353 = vrcp.f32 %v444_v23 }
 0xa9e   :  { %v1354_v24 = vpop.eup %1353 }
 0xa9f   :  { %v453_v27 = vmul.f32 %v1354_v24, %v355_v6 }
 0xb02   :  { %v450_v25 = vpop.permute.xlu0 %449 }
 0xb03   :  { %v452_v26 = vmul.f32 %v1354_v24, %v450_v25 }
 0xb05   :  { %455 = vrot.lane.b32.xlu1 %v452_v26, %s1386_s8 }
 0xb77   :  { %v456_v28 = vpop.permute.xlu1 %455 }
 0xb78   :  { %v458_v29 = vadd.f32 %v456_v28, %v453_v27 }
 0xb7a   :  { %1355 = vtanh.f32 %v458_v29 }
 0xb84   :  { %v1356_v30 = vpop.eup %1355 }
 0xb85   :  { %461 = vrot.lane.b32.xlu0 %v1356_v30, %s1381_s23  ;;  %v824_v30 = vld [vmem:[%s1712_s2 + $0x88] sm:$0xff] }
 0xbf7   :  { %v462_v31 = vpop.permute.xlu0 %461 }
 0xbf8   :  { %v464_v32 = vmul.f32 %v1354_v24, %v462_v31  ;;  %v807_v31 = vld [vmem:[%s1712_s2] sm:$0xff] }
 0xbfa   :  { %v465_v34 = vmax.f32 %v464_v32, 0.0  ;;  %469 = vrot.lane.b32.xlu1 %v464_v32, %s1386_s8 }
 0xbfc   :  { %v1527_v35 = vpack.i.bf16 %v48_v33, %v465_v34  ;;  %v808_v33 = vld [vmem:[%s1712_s2 + $0x8] sm:$0xff]  ;;  %v825_v34 = vld [vmem:[%s1712_s2 + $0x90] sm:$0xff] }
 0xc6c   :  { %v470_v36 = vpop.permute.xlu1 %469 }
 0xc6d   :  { %1172 = vmatmul.mubr.msk.f32.vlgmr.msra.gmra.mrb[6].mxu0 %vm54_vm1, %v470_v36  ;;  %v1257_v36 = vpack.c.bf16 %v808_v33, %v807_v31 }
 0xc6e   :  { %1251 = vmatpush3.bf16.msra.mxu0 %v1438_v13  ;;  %1193 = vmatprep.mubr.msk.f32.mxu0 %vm1383_vm0, %v1384_v12 }
 0xc6f   :  { %1252 = vmatprep.subr.bf16.mxu0 %v1382_v8 }
 0xc72   :  { %1254 = vmatpush3.bf16.msra.mxu0 %v1447_v15 }
 0xc73   :  { %1287 = vmatprep.subr.bf16.mxu0 %v1382_v8 }
 0xd40   :  { %v539_v38 = vpop.f32.mrb[6].mxu0 }
 0xd41   :  { %v543_v39 = vadd.f32 %v1028_v18, %v539_v38  ;;  %v1173_v40 = vpop.f32.mrb[7].mxu0  ;;  %v809_v38 = vld [vmem:[%s1712_s2 + $0x10] sm:$0xff] }
 0xd42   :  { %v827_v40 = vld [vmem:[%s1712_s2 + $0xa0] sm:$0xff] }
 0xd43   :  { %1357 = vtanh.f32 %v543_v39  ;;  %v1030_v13 = vmul.f32 -1.442695, %v543_v39  ;;  %v810_v39 = vld [vmem:[%s1712_s2 + $0x18] sm:$0xff] }
 0xd45   :  { %1359 = vpow2.f32 %v1030_v13  ;;  %v1261_v13 = vpack.c.bf16 %v810_v39, %v809_v38  ;;  %v362_v39 = vmax.f32 %v1509_v10, 0.0 }
 0xd4d   :  { %v1358_v41 = vpop.eup %1357 }
 0xd4e   :  { %552 = vrot.lane.b32.xlu0 %v1358_v41, %s1381_s23  ;;  %v828_v41 = vld [vmem:[%s1712_s2 + $0xa8] sm:$0xff] }
 0xd4f   :  { %v1360_v42 = vpop.eup %1359 }
 0xd50   :  { %v547_v43 = vadd.f32 1.0, %v1360_v42  ;;  %v1263_v42 = vpack.c.bf16 %v828_v41, %v827_v40 }
 0xd52   :  { %1361 = vrcp.f32 %v547_v43  ;;  %v811_v43 = vld [vmem:[%s1712_s2 + $0x20] sm:$0xff] }
 0xd5c   :  { %v1362_v44 = vpop.eup %1361 }
 0xd5d   :  { %v556_v46 = vmul.f32 %v1362_v44, %v458_v29  ;;  %v823_v29 = vld [vmem:[%s1712_s2 + $0x80] sm:$0xff] }
 0xd5e   :  { %v1255_v32 = vpack.c.bf16 %v824_v30, %v823_v29 }
 0xd60   :  { %1256 = vmatprep.subr.bf16.mxu1 %v1255_v32 }
 0xdc0   :  { %v553_v15 = vpop.permute.xlu0 %552 }
 0xdc1   :  { %v555_v45 = vmul.f32 %v1362_v44, %v553_v15  ;;  %v829_v15 = vld [vmem:[%s1712_s2 + $0xb0] sm:$0xff] }
 0xdc3   :  { %558 = vrot.lane.b32.xlu1 %v555_v45, %s1386_s8  ;;  %v830_v45 = vld [vmem:[%s1712_s2 + $0xb8] sm:$0xff] }
 0xe35   :  { %v559_v47 = vpop.permute.xlu1 %558 }
 0xe36   :  { %v561_v48 = vadd.f32 %v559_v47, %v556_v46  ;;  %v1267_v47 = vpack.c.bf16 %v830_v45, %v829_v15  ;;  %v923_v15 = vld [vmem:[%s1713_s4 + $0x30] sm:$0x3]  ;;  %v11_v45 = vstv %s1714_s5 }
 0xe37   :  { %12 = vst [vmem:[#allocation2] sm:$0x1] %v11_v45 }
 0xe38   :  { %1363 = vtanh.f32 %v561_v48 }
 0xe42   :  { %v1364_v49 = vpop.eup %1363 }
 0xe43   :  { %564 = vrot.lane.b32.xlu0 %v1364_v49, %s1381_s23  ;;  %v814_v49 = vld [vmem:[%s1712_s2 + $0x38] sm:$0xff] }
 0xeb5   :  { %v565_v50 = vpop.permute.xlu0 %564 }
 0xeb6   :  { %v567_v51 = vmul.f32 %v1362_v44, %v565_v50  ;;  %v812_v44 = vld [vmem:[%s1712_s2 + $0x28] sm:$0xff]  ;;  %v831_v50 = vld [vmem:[%s1712_s2 + $0xc0] sm:$0xff] }
 0xeb7   :  { %v1265_v46 = vpack.c.bf16 %v812_v44, %v811_v43  ;;  %v921_v43 = vld [vmem:[%s1713_s4 + $0x20] sm:$0xff]  ;;  %v922_v44 = vld [vmem:[%s1713_s4 + $0x28] sm:$0xff] }
 0xeb8   :  { %v568_v53 = vmax.f32 %v567_v51, 0.0  ;;  %572 = vrot.lane.b32.xlu1 %v567_v51, %s1386_s8  ;;  %v832_v51 = vld [vmem:[%s1712_s2 + $0xc8] sm:$0xff]  ;;  %v1294_v10 = vpack.c.bf16 %v922_v44, %v921_v43 }
 0xeba   :  { %v1544_v54 = vpack.i.bf16 %v156_v52, %v568_v53  ;;  %v1271_v53 = vpack.c.bf16 %v832_v51, %v831_v50  ;;  %v1038_v51 = vld [vmem:[#allocation2] ss:$0 sm:$0xff] }
 0xf2a   :  { %v573_v56 = vpop.permute.xlu1 %572 }
 0xf2b   :  { %1183 = vmatmul.mubr.msk.f32.vlgmr.msra.gmra.mrb[2].mxu1 %vm54_vm1, %v573_v56  ;;  %v815_v56 = vld [vmem:[%s1712_s2 + $0x40] sm:$0xff] }
 0xf2c   :  { %1258 = vmatpush3.bf16.msra.mxu1 %v1257_v36 }
 0xffe   :  { %v642_v58 = vpop.f32.mrb[2].mxu1 }
 0xfff   :  { %v646_v59 = vadd.f32 %v1031_v57, %v642_v58  ;;  %v1184_v60 = vpop.f32.mrb[3].mxu1  ;;  %v816_v57 = vld [vmem:[%s1712_s2 + $0x48] sm:$0xff]  ;;  %v833_v58 = vld [vmem:[%s1712_s2 + $0xd0] sm:$0xff] }
0x1000   :  { %v1273_v60 = vpack.c.bf16 %v816_v57, %v815_v56 }
0x1001   :  { %1365 = vtanh.f32 %v646_v59  ;;  %v1033_v37 = vmul.f32 -1.442695, %v646_v59  ;;  %v834_v59 = vld [vmem:[%s1712_s2 + $0xd8] sm:$0xff] }
0x1003   :  { %1367 = vpow2.f32 %v1033_v37  ;;  %v817_v37 = vld [vmem:[%s1712_s2 + $0x50] sm:$0xff] }
0x100b   :  { %v1366_v61 = vpop.eup %1365 }
0x100c   :  { %655 = vrot.lane.b32.xlu0 %v1366_v61, %s1381_s23  ;;  %v1275_v61 = vpack.c.bf16 %v834_v59, %v833_v58 }
0x100d   :  { %v1368_v62 = vpop.eup %1367 }
0x100e   :  { %v650_v63 = vadd.f32 1.0, %v1368_v62  ;;  %v818_v62 = vld [vmem:[%s1712_s2 + $0x58] sm:$0xff] }
0x1010   :  { %1369 = vrcp.f32 %v650_v63  ;;  %v1277_v63 = vpack.c.bf16 %v818_v62, %v817_v37 }
0x101a   :  { %v1370_v0 = vpop.eup %1369 }
0x101b   :  { %v659_v3 = vmul.f32 %v1370_v0, %v561_v48  ;;  %v813_v48 = vld [vmem:[%s1712_s2 + $0x30] sm:$0xff] }
0x101c   :  { %v1269_v52 = vpack.c.bf16 %v814_v49, %v813_v48 }
0x107e   :  { %v656_v1 = vpop.permute.xlu0 %655 }
0x107f   :  { %v658_v2 = vmul.f32 %v1370_v0, %v656_v1 }
0x1081   :  { %661 = vrot.lane.b32.xlu1 %v658_v2, %s1386_s8  ;;  %v835_v2 = vld [vmem:[%s1712_s2 + $0xe0] sm:$0xff] }
0x10f3   :  { %v662_v4 = vpop.permute.xlu1 %661 }
0x10f4   :  { %v1552_v5 = vadd.f32 %v662_v4, %v659_v3  ;;  %v836_v3 = vld [vmem:[%s1712_s2 + $0xe8] sm:$0xff] }
0x10f6   :  { %1371 = vtanh.f32 %v1552_v5 }
0x1100   :  { %v1372_v6 = vpop.eup %1371 }
0x1101   :  { %667 = vrot.lane.b32.xlu0 %v1372_v6, %s1381_s23  ;;  %v1279_v6 = vpack.c.bf16 %v836_v3, %v835_v2 }
0x1173   :  { %v668_v7 = vpop.permute.xlu0 %667 }
0x1174   :  { %v670_v9 = vmul.f32 %v1370_v0, %v668_v7  ;;  %v819_v7 = vld [vmem:[%s1712_s2 + $0x60] sm:$0xff] }
0x1176   :  { %v671_v14 = vmax.f32 %v670_v9, 0.0  ;;  %675 = vrot.lane.b32.xlu1 %v670_v9, %s1386_s8  ;;  %v820_v9 = vld [vmem:[%s1712_s2 + $0x68] sm:$0xff] }
0x1178   :  { %v1312_v16 = vpack.i.bf16 %v259_v11, %v671_v14  ;;  %v837_v11 = vld [vmem:[%s1712_s2 + $0xf0] sm:$0xff]  ;;  %v838_v14 = vld [vmem:[%s1712_s2 + $0xf8] sm:$0xff] }
0x11e8   :  { %v676_v17 = vpop.permute.xlu1 %675 }
0x11e9   :  { %1194 = vmatmul.mubr.msk.f32.vlgmr.msra.gmra.mrb[8].mxu0 %vm54_vm1, %v676_v17  ;;  %v821_v17 = vld [vmem:[%s1712_s2 + $0x70] sm:$0xff] }
0x11ea   :  { %1210 = vmatprep.mubr.msk.f32.mxu0 %vm1383_vm0, %v1384_v12 }
0x12bc   :  { %v745_v20 = vpop.f32.mrb[8].mxu0 }
0x12bd   :  { %v749_v21 = vadd.f32 %v1034_v19, %v745_v20  ;;  %v1195_v22 = vpop.f32.mrb[9].mxu0  ;;  %v822_v19 = vld [vmem:[%s1712_s2 + $0x78] sm:$0xff] }
0x12be   :  { %v1285_v20 = vpack.c.bf16 %v822_v19, %v821_v17  ;;  %v918_v22 = vld [vmem:[%s1713_s4 + $0x8] sm:$0xff] }
0x12bf   :  { %1373 = vtanh.f32 %v749_v21  ;;  %v1036_v55 = vmul.f32 -1.442695, %v749_v21  ;;  %v917_v21 = vld [vmem:[%s1713_s4] sm:$0xff] }
0x12c1   :  { %1375 = vpow2.f32 %v1036_v55 }
0x12c9   :  { %v1374_v23 = vpop.eup %1373 }
0x12ca   :  { %758 = vrot.lane.b32.xlu0 %v1374_v23, %s1381_s23  ;;  %v919_v23 = vld [vmem:[%s1713_s4 + $0x10] sm:$0xff] }
0x12cb   :  { %v1376_v24 = vpop.eup %1375 }
0x12cc   :  { %v753_v25 = vadd.f32 1.0, %v1376_v24  ;;  %v1288_v24 = vpack.c.bf16 %v918_v22, %v917_v21 }
0x12ce   :  { %1377 = vrcp.f32 %v753_v25  ;;  %v920_v25 = vld [vmem:[%s1713_s4 + $0x18] sm:$0xff]  ;;  %1289 = vmatpush3.bf16.msra.mxu0 %v1288_v24 }
0x12cf   :  { %1290 = vmatprep.subr.bf16.mxu0 %v1382_v8 }
0x12d8   :  { %v1565_v26 = vpop.eup %1377 }
0x12d9   :  { %v762_v0 = vmul.f32 %v1565_v26, %v1552_v5  ;;  %v1281_v5 = vpack.c.bf16 %v820_v9, %v819_v7 }
0x133c   :  { %v759_v27 = vpop.permute.xlu0 %758 }
0x133d   :  { %v761_v28 = vmul.f32 %v1565_v26, %v759_v27  ;;  %v1291_v27 = vpack.c.bf16 %v920_v25, %v919_v23 }
0x133f   :  { %764 = vrot.lane.b32.xlu1 %v761_v28, %s1386_s8  ;;  %1292 = vmatpush3.bf16.msra.mxu0 %v1291_v27 }
0x1340   :  { %1293 = vmatprep.subr.bf16.mxu0 %v1382_v8 }
0x1343   :  { %1303 = vrot.lane.b32.xlu1 %v1527_v35, %s1386_s8  ;;  %v826_v35 = vld [vmem:[%s1712_s2 + $0x98] sm:$0xff]  ;;  %1295 = vmatpush3.bf16.msra.mxu0 %v1294_v10 }
0x1344   :  { %v1259_v18 = vpack.c.bf16 %v826_v35, %v825_v34  ;;  %1208 = vmatprep.subr.mxu0 %v1384_v12 }
0x1346   :  { %1260 = vmatprep.subr.bf16.mxu1 %v1259_v18 }
0x1347   :  { %1313 = vrot.lane.b32.xlu1 %v1312_v16, %s1385_s1  ;;  %1262 = vmatpush3.bf16.msra.mxu1 %v1261_v13  ;;  %v1283_v16 = vpack.c.bf16 %v838_v14, %v837_v11 }
0x1348   :  { %1264 = vmatprep.subr.bf16.mxu1 %v1263_v42  ;;  %1209 = vmatpush3.msk.msra.mxu0 %vm935_vm4, %v923_v15 }
0x134b   :  { %1266 = vmatpush3.bf16.msra.mxu1 %v1265_v46 }
0x134c   :  { %1268 = vmatprep.subr.bf16.mxu1 %v1267_v47  ;;  %v1037_v47 = vld [vmem:[%s1715_s3] ss:$0 sm:$0xff] }
0x134f   :  { %1270 = vmatpush3.bf16.msra.mxu1 %v1269_v52 }
0x1350   :  { %1272 = vmatprep.subr.bf16.mxu1 %v1271_v53 }
0x1353   :  { %1274 = vmatpush3.bf16.msra.mxu1 %v1273_v60 }
0x1354   :  { %1276 = vmatprep.subr.bf16.mxu1 %v1275_v61 }
0x1357   :  { %1278 = vmatpush3.bf16.msra.mxu1 %v1277_v63 }
0x1358   :  { %1280 = vmatprep.subr.bf16.mxu1 %v1279_v6 }
0x135b   :  { %1282 = vmatpush3.bf16.msra.mxu1 %v1281_v5 }
0x135c   :  { %1284 = vmatprep.subr.bf16.mxu1 %v1283_v16 }
0x135f   :  { %1286 = vmatpush3.bf16.msra.mxu1 %v1285_v20 }
0x13b1   :  { %v765_v1 = vpop.permute.xlu1 %764 }
0x13b2   :  { %v767_v4 = vadd.f32 %v765_v1, %v762_v0 }
0x13b4   :  { %1379 = vtanh.f32 %v767_v4 }
0x13b5   :  { %v1304_v28 = vpop.permute.xlu1 %1303 }
0x13b6   :  { %v1306_v32 = vunpack.i.h.bf16 %v1304_v28  ;;  %v1305_v34 = vunpack.i.l.bf16 %v1304_v28 }
0x13b9   :  { %v1314_v30 = vpop.permute.xlu1 %1313 }
0x13ba   :  { %v1316_v18 = vunpack.i.h.bf16 %v1314_v30  ;;  %v1315_v38 = vunpack.i.l.bf16 %v1314_v30 }
0x13be   :  { %v1380_v55 = vpop.eup %1379 }
0x13bf   :  { %770 = vrot.lane.b32.xlu0 %v1380_v55, %s1381_s23 }
0x13c3   :  { %1308 = vrot.lane.b32.xlu0 %v1544_v54, %s1381_s23 }
0x1431   :  { %v771_v29 = vpop.permute.xlu0 %770 }
0x1432   :  { %v773_v31 = vmul.f32 %v1565_v26, %v771_v29 }
0x1434   :  { %v774_v54 = vmax.f32 %v773_v31, 0.0 }
0x1435   :  { %v1309_v33 = vpop.permute.xlu0 %1308 }
0x1436   :  { %v1311_v35 = vunpack.i.h.bf16 %v1309_v33  ;;  %v1310_v36 = vunpack.i.l.bf16 %v1309_v33 }
0x1438   :  { %v799_v40 = vsel %vm54_vm1, %v1306_v32, %v1311_v35  ;;  %v804_v8 = vsel %vm54_vm1, %v1305_v34, %v1310_v36 }
0x1439   :  { %v805_v41 = vsel %vm800_vm2, %v804_v8, %v1315_v38  ;;  %v801_v13 = vsel %vm800_vm2, %v799_v40, %v1316_v18 }
0x143a   :  { %v806_v42 = vsel %vm802_vm3, %v805_v41, %v774_v54  ;;  %v803_v26 = vsel %vm802_vm3, %v801_v13, %v362_v39 }
0x143b   :  { %910 = vmatprep.mubr.f32.mxu1 %v806_v42 }
0x143c   :  { %911 = vmatmul.mubr.f32.vlgmr.msra.gmra.mrb[4].mxu1 %v803_v26 }
0x150f   :  { %v1108_v46 = vpop.f32.mrb[4].mxu1 }
0x1510   :  { %v1109_v48 = vpop.f32.mrb[5].mxu1 }
0x1511   :  { %v1110_v49 = vadd.f32 %v1109_v48, %v1108_v46 }
0x1513   :  { %v913_v50 = vadd.f32 %v1110_v49, %v1037_v47 }
0x1515   :  { %v916_v12 = vmax.f32 %v913_v50, 0.0 }
0x1517   :  { %1211 = vmatmul.mubr.msk.f32.vlgmr.msra.gmra.mrb[10].mxu0 %vm931_vm5, %v916_v12 }
0x15ea   :  { %v1005_v52 = vpop.f32.mrb[10].mxu0 }
0x15eb   :  { %v1006_v53 = vadd.f32 %v1038_v51, %v1005_v52  ;;  %v1212_v56 = vpop.f32.mrb[11].mxu0 }
0x15ed   :  { %1010 = vst.msk [vmem:[%s1716_s6] sm:$0x3] %vm1009_vm6, %v1006_v53 }

</bundles_post_ra>
